<compile_context>
chip_gen: v7x
topology: tpu7x:2x2x1
jax: 0.10.0
libtpu: 0.0.40
codegen_flags: <defaults>
</compile_context>

<pallas_src>
import functools

import jax
import jax.numpy as jnp
from jax.experimental import pallas as pl
from jax.experimental.pallas import tpu as pltpu


_UNROLL_LIMIT = 16  # static unroll below this trip count, fori_loop above


def _serial_loop(lo, hi, body, init):
    """Serial recurrence helper: static unroll for short horizons (LLO
    visibility), lax.fori_loop for long ones (flat code size / live ranges)."""
    trip = hi - lo
    if trip <= 0:
        return init
    if trip <= _UNROLL_LIMIT:
        s = init
        for t in range(lo, hi):          # t is a Python int -> static indexing
            s = body(t, s)
        return s
    return jax.lax.fori_loop(lo, hi, body, init)


def _make_ecnn_kernel(Tp, Tf, compute_dtype):
    """Build the kernel for static horizons Tp (past) / Tf (forecast)."""
    T_total = Tp + Tf

    def kernel(u_ref, ypad_ref, wA_ref, wAf_ref, wB_ref, wD_ref, cT_ref,
               bias_ref, s0_ref, out_ref, inp_ref, states_ref):
        # u_ref     : (Tp, bB, nU)        explanatory features (batch block)
        # ypad_ref  : (T_total, bB, nY)   targets, zero-padded over forecast
        # wA_ref    : (H, H)              W_hh^T
        # wAf_ref   : (H, H)              fused W_hh^T + C^T D^T
        # wB_ref    : (nU, H)             W_ih[:, :nU]^T
        # wD_ref    : (nY, H)             W_ih[:, nU:]^T
        # cT_ref    : (H, nY)             C^T
        # bias_ref  : (1, H)              b_ih + b_hh
        # s0_ref    : (1, H)              learned initial state
        # out_ref   : (T_total, bB, nY)   concat(past_error, forecast)
        # inp_ref   : (Tp+1, bB, H) f32   per-step additive input slab (scratch)
        # states_ref: (T_total, bB, H) f32  hidden states (scratch)
        bB = u_ref.shape[1]
        nU = u_ref.shape[2]
        nY = ypad_ref.shape[2]
        H = wA_ref.shape[0]
        cd = compute_dtype

        # Weights loaded once; cast to MXU operand dtype (bf16 on v6e/v7x).
        wA = wA_ref[...].astype(cd)
        wAf = wAf_ref[...].astype(cd)
        wB = wB_ref[...].astype(cd)
        wD = wD_ref[...].astype(cd)
        cT = cT_ref[...].astype(cd)

        # Hoisted broadcast (done once, not per step).
        bias_b = jnp.broadcast_to(bias_ref[...], (bB, H))          # f32

        # ---- Off-critical-path: project every timestep's inputs at once. ----
        u_all = u_ref[...].reshape(Tp * bB, nU).astype(cd)
        y_all = ypad_ref[pl.ds(0, Tp)].reshape(Tp * bB, nY).astype(cd)
        projU = jnp.dot(u_all, wB, preferred_element_type=jnp.float32)
        projU = projU.reshape(Tp, bB, H)
        projY = jnp.dot(y_all, wD, preferred_element_type=jnp.float32)
        projY = projY.reshape(Tp, bB, H)

        # Per-step additive input slab (f32, in VMEM scratch):
        #   k = 0         : U[0] + b                 (no error feedback)
        #   k = 1..Tp-1   : U[k] - Y[k-1]@D^T + b    (error folded into wAf)
        #   k = Tp        : b - Y[Tp-1]@D^T          (no U; only if Tf >= 1)
        #   k > Tp        : b                        (added directly in phase C)
        inp_ref[0] = projU[0] + bias_b
        if Tp > 1:
            inp_ref[pl.ds(1, Tp - 1)] = projU[1:] - projY[:Tp - 1] + bias_b
        if Tf >= 1:
            inp_ref[Tp] = bias_b - projY[Tp - 1]

        # ---- Serial recurrence: one MXU dot + add + tanh per step. ----
        def step(t, s, W):
            pre = jnp.dot(s, W, preferred_element_type=jnp.float32) + inp_ref[t]
            s_f32 = jnp.tanh(pre)                 # f32 adds / tanh (EUP)
            states_ref[t] = s_f32                 # direct scratch write
            return s_f32.astype(cd)               # next-step MXU operand

        def step_bias_only(t, s, W):
            pre = jnp.dot(s, W, preferred_element_type=jnp.float32) + bias_b
            s_f32 = jnp.tanh(pre)
            states_ref[t] = s_f32
            return s_f32.astype(cd)

        s = jnp.broadcast_to(s0_ref[...], (bB, H)).astype(cd)
        # Phase A: k = 0, plain A (no error feedback yet).
        s = step(0, s, wA)
        # Phase B: k = 1 .. Tp (last past step only if Tf >= 1), fused A.
        b_hi = Tp + 1 if Tf >= 1 else Tp
        s = _serial_loop(1, b_hi, lambda t, ss: step(t, ss, wAf), s)
        # Phase C: forecast steps k = Tp+1 .. T_total-1, plain A, bias only.
        # (The dead final state update of the module's forecast loop is omitted.)
        s = _serial_loop(Tp + 1, T_total,
                         lambda t, ss: step_bias_only(t, ss, wA), s)

        # ---- Epilogue: all C s_t in one matmul, single full-block store. ----
        # TODO(synk): for nY==1 and large T*B, a VPU multiply + lane reduction
        # (or a lane-dense (T, bB) output layout) would avoid the lane-sparse
        # N=1 MXU pass and masked stores; negligible at these shapes.
        S = states_ref[...].reshape(T_total * bB, H).astype(cd)
        yhat = jnp.dot(S, cT, preferred_element_type=jnp.float32)
        yhat = yhat.reshape(T_total, bB, nY)
        # Ypad is zero over the forecast rows, so this single subtraction gives
        # both the past errors and the raw forecasts (no concatenate).
        out_ref[...] = yhat - ypad_ref[...]

    return kernel


def _round_up(x, m):
    return ((x + m - 1) // m) * m


def _vmem_limit_bytes(Tp, Tf, bB, nU, nY, H, compute_dtype):
    """Rough per-invocation VMEM budget -> explicit limit (v5e default scoped
    limit is 16 MiB; v7x physical VMEM is 64 MiB)."""
    f32 = 4
    cdb = jnp.dtype(compute_dtype).itemsize
    T_total = Tp + Tf
    io_blocks = 2 * (Tp * bB * nU * f32            # U block, double-buffered
                     + T_total * bB * nY * f32     # Ypad block
                     + T_total * bB * nY * f32)    # out block
    weights = (2 * H * H + nU * H + nY * H + H * nY + 2 * H) * f32 * 2
    scratch = (Tp + 1) * bB * H * f32 + T_total * bB * H * f32
    temps = 3 * T_total * bB * H * max(f32, cdb)   # projections / epilogue
    est = io_blocks + weights + scratch + temps
    return int(min(max(2 * est, 32 * 1024 * 1024), 64 * 1024 * 1024))


@functools.partial(jax.jit,
                   static_argnames=("forecast_horizon", "compute_dtype",
                                    "batch_block"))
def ecnn_forward(U, Y, wA, wB, wD, cT, bias, s0, *, forecast_horizon,
                 compute_dtype=jnp.float32, batch_block=None):
    """ECNN forward.  U: (Tp, B, nU), Y: (Tp, B, nY) -> (Tp+Tf, B, nY).

    compute_dtype: MXU operand dtype. jnp.bfloat16 is the fast path on
    v6e/v7x (f32 accumulation is kept everywhere); jnp.float32 is exact.
    """
    Tp, B, nU = U.shape
    nY = Y.shape[2]
    H = wA.shape[0]
    Tf = forecast_horizon
    T_total = Tp + Tf

    # Algebraic fold of the error feedback (f32, done once on the host graph):
    #   s@wA + ((s@cT) - y)@wD  ==  s@(wA + cT@wD) - y@wD
    wAf = wA + cT @ wD

    # Batch blocking: pad to a multiple of the block so the grid axis can be
    # sharded across TensorCores ("parallel") when the batch is large.
    if batch_block is None:
        bB = min(_round_up(B, 8), 128)
    else:
        bB = _round_up(batch_block, 8)
    Bp = _round_up(B, bB)
    pad_b = Bp - B

    U_p = jnp.pad(U, ((0, 0), (0, pad_b), (0, 0)))
    # Zero-pad Y over the forecast horizon too -> single epilogue subtraction.
    Y_p = jnp.pad(Y, ((0, Tf), (0, pad_b), (0, 0)))

    grid = (Bp // bB,)
    kernel = _make_ecnn_kernel(Tp, Tf, compute_dtype)

    # TODO(synk): for very large batches, emit a lane-dense (T, bB) output
    # layout (batch in the lane dim) and transpose in the wrapper; at nY==1
    # the current layout stores 1 of 128 lanes per vst (irrelevant at small B).
    out_p = pl.pallas_call(
        kernel,
        out_shape=jax.ShapeDtypeStruct((T_total, Bp, nY), jnp.float32),
        grid_spec=pltpu.PrefetchScalarGridSpec(
            num_scalar_prefetch=0,
            grid=grid,
            in_specs=[
                pl.BlockSpec((Tp, bB, nU), lambda b: (0, b, 0)),       # U
                pl.BlockSpec((T_total, bB, nY), lambda b: (0, b, 0)),  # Ypad
                pl.BlockSpec((H, H), lambda b: (0, 0)),                # wA
                pl.BlockSpec((H, H), lambda b: (0, 0)),                # wAf
                pl.BlockSpec((nU, H), lambda b: (0, 0)),               # wB
                pl.BlockSpec((nY, H), lambda b: (0, 0)),               # wD
                pl.BlockSpec((H, nY), lambda b: (0, 0)),               # cT
                pl.BlockSpec((1, H), lambda b: (0, 0)),                # bias
                pl.BlockSpec((1, H), lambda b: (0, 0)),                # s0
            ],
            out_specs=pl.BlockSpec((T_total, bB, nY), lambda b: (0, b, 0)),
            scratch_shapes=[
                pltpu.VMEM((Tp + 1, bB, H), jnp.float32),    # input slab
                pltpu.VMEM((T_total, bB, H), jnp.float32),   # hidden states
            ],
        ),
        compiler_params=pltpu.CompilerParams(
            dimension_semantics=("parallel",),
            vmem_limit_bytes=_vmem_limit_bytes(Tp, Tf, bB, nU, nY, H,
                                               compute_dtype),
        ),
    )(U_p, Y_p, wA, wAf, wB, wD, cT, bias, s0)

    return out_p[:, :B, :]


def ecnn_reference(U, Y, wA, wB, wD, cT, bias, s0, forecast_horizon):
    """Pure-JAX reference of the unfused recurrence (for correctness check)."""
    Tp, B, nU = U.shape
    nY = Y.shape[2]
    H = wA.shape[0]

    def cell(s, u_feed, err_feed):
        return jnp.tanh(s @ wA + u_feed @ wB + err_feed @ wD + bias)

    s = jnp.broadcast_to(s0, (B, H))
    outs = []
    s = cell(s, U[0], jnp.zeros((B, nY), jnp.float32))
    for t in range(1, Tp):
        err = s @ cT - Y[t - 1]
        outs.append(err)
        s = cell(s, U[t], err)
    err = s @ cT - Y[Tp - 1]
    outs.append(err)
    s = cell(s, jnp.zeros((B, nU), jnp.float32), err)
    for _ in range(forecast_horizon):
        outs.append(s @ cT)
        s = cell(s, jnp.zeros((B, nU), jnp.float32),
                 jnp.zeros((B, nY), jnp.float32))
    return jnp.stack(outs, axis=0)


if __name__ == "__main__":
    # Small, module-consistent shapes.
    n_features_U = 4
    n_features_Y = 1
    n_state_neurons = 32
    past_horizon = 8
    forecast_horizon = 3
    batchsize = 4

    key = jax.random.PRNGKey(0)
    ks = jax.random.split(key, 8)

    # Deterministic parameter init mirroring nn.RNNCell / nn.Linear shapes.
    bound = 1.0 / (n_state_neurons ** 0.5)
    W_ih = jax.random.uniform(ks[0], (n_state_neurons, n_features_U + n_features_Y),
                              minval=-bound, maxval=bound, dtype=jnp.float32)
    W_hh = jax.random.uniform(ks[1], (n_state_neurons, n_state_neurons),
                              minval=-bound, maxval=bound, dtype=jnp.float32)
    b_ih = jax.random.uniform(ks[2], (n_state_neurons,),
                              minval=-bound, maxval=bound, dtype=jnp.float32)
    b_hh = jax.random.uniform(ks[3], (n_state_neurons,),
                              minval=-bound, maxval=bound, dtype=jnp.float32)
    C_w = jax.random.uniform(ks[4], (n_features_Y, n_state_neurons),
                             minval=-bound, maxval=bound, dtype=jnp.float32)
    init_state = jax.random.uniform(ks[5], (1, n_state_neurons),
                                    minval=0.0, maxval=1.0, dtype=jnp.float32)

    # Pre-transposed weights for x @ W layout in the kernel.
    wA = W_hh.T                                   # (H, H)
    wB = W_ih[:, :n_features_U].T                 # (nU, H)
    wD = W_ih[:, n_features_U:].T                 # (nY, H)
    cT = C_w.T                                    # (H, nY)
    bias = (b_ih + b_hh)[None, :]                 # (1, H)

    # Inputs: U (past_horizon, batch, nU), Y (past_horizon, batch, nY).
    U = jax.random.normal(ks[6], (past_horizon, batchsize, n_features_U),
                          dtype=jnp.float32)
    Y = jax.random.normal(ks[7], (past_horizon, batchsize, n_features_Y),
                          dtype=jnp.float32)

    ref = ecnn_reference(U, Y, wA, wB, wD, cT, bias, init_state,
                         forecast_horizon)

    # f32 operands: exact-path validation against the unfused reference.
    out = ecnn_forward(U, Y, wA, wB, wD, cT, bias, init_state,
                       forecast_horizon=forecast_horizon)
    out = jax.block_until_ready(out)
    assert out.shape == (past_horizon + forecast_horizon, batchsize, n_features_Y)
    assert jnp.allclose(out, ref, atol=1e-3, rtol=1e-3), "f32 mismatch vs reference"

    # bf16 MXU operands (v6e/v7x fast path), f32 accumulation everywhere.
    # Operand rounding compounds through the tanh recurrence, so this is a
    # loose sanity check rather than a bit-accuracy assertion.
    out_bf16 = ecnn_forward(U, Y, wA, wB, wD, cT, bias, init_state,
                            forecast_horizon=forecast_horizon,
                            compute_dtype=jnp.bfloat16)
    out_bf16 = jax.block_until_ready(out_bf16)
    assert out_bf16.shape == out.shape
    assert bool(jnp.all(jnp.isfinite(out_bf16)))
    assert float(jnp.max(jnp.abs(out_bf16 - ref))) < 1.0, "bf16 path diverged"

    print("KERNEL_OK")
</pallas_src>

<mosaic_0001>
module attributes {stable_mosaic.version = 11 : i64} {
  func.func @kernel(%arg0: i32, %arg1: memref<8x8x4xf32, #tpu.memory_space<vmem>>, %arg2: memref<11x8x1xf32, #tpu.memory_space<vmem>>, %arg3: memref<32x32xf32, #tpu.memory_space<vmem>>, %arg4: memref<32x32xf32, #tpu.memory_space<vmem>>, %arg5: memref<4x32xf32, #tpu.memory_space<vmem>>, %arg6: memref<1x32xf32, #tpu.memory_space<vmem>>, %arg7: memref<32x1xf32, #tpu.memory_space<vmem>>, %arg8: memref<1x32xf32, #tpu.memory_space<vmem>>, %arg9: memref<1x32xf32, #tpu.memory_space<vmem>>, %arg10: memref<11x8x1xf32, #tpu.memory_space<vmem>>, %arg11: memref<9x8x32xf32, #tpu.memory_space<vmem>>, %arg12: memref<11x8x32xf32, #tpu.memory_space<vmem>>) attributes {dimension_semantics = [#tpu.dimension_semantics<parallel>], iteration_bounds = array<i64: 1>, scalar_prefetch = 0 : i64, scratch_operands = 2 : i64, tpu.core_type = #tpu.core_type<tc>, window_params = [{transform_indices = @transform_0, window_bounds = array<i64: 8, 8, 4>}, {transform_indices = @transform_1, window_bounds = array<i64: 11, 8, 1>}, {pipeline_mode = #tpu.pipeline_mode<synchronous>, transform_indices = @transform_2, window_bounds = array<i64: 32, 32>}, {pipeline_mode = #tpu.pipeline_mode<synchronous>, transform_indices = @transform_3, window_bounds = array<i64: 32, 32>}, {pipeline_mode = #tpu.pipeline_mode<synchronous>, transform_indices = @transform_4, window_bounds = array<i64: 4, 32>}, {pipeline_mode = #tpu.pipeline_mode<synchronous>, transform_indices = @transform_5, window_bounds = array<i64: 1, 32>}, {pipeline_mode = #tpu.pipeline_mode<synchronous>, transform_indices = @transform_6, window_bounds = array<i64: 32, 1>}, {pipeline_mode = #tpu.pipeline_mode<synchronous>, transform_indices = @transform_7, window_bounds = array<i64: 1, 32>}, {pipeline_mode = #tpu.pipeline_mode<synchronous>, transform_indices = @transform_8, window_bounds = array<i64: 1, 32>}, {transform_indices = @transform_9, window_bounds = array<i64: 11, 8, 1>}]} {
    %c0 = arith.constant 0 : index
    %c0_0 = arith.constant 0 : index
    %0 = vector.load %arg3[%c0, %c0_0] : memref<32x32xf32, #tpu.memory_space<vmem>>, vector<32x32xf32>
    %c0_1 = arith.constant 0 : index
    %c0_2 = arith.constant 0 : index
    %1 = vector.load %arg4[%c0_1, %c0_2] : memref<32x32xf32, #tpu.memory_space<vmem>>, vector<32x32xf32>
    %c0_3 = arith.constant 0 : index
    %c0_4 = arith.constant 0 : index
    %2 = vector.load %arg5[%c0_3, %c0_4] : memref<4x32xf32, #tpu.memory_space<vmem>>, vector<4x32xf32>
    %c0_5 = arith.constant 0 : index
    %c0_6 = arith.constant 0 : index
    %3 = vector.load %arg6[%c0_5, %c0_6] : memref<1x32xf32, #tpu.memory_space<vmem>>, vector<1x32xf32>
    %c0_7 = arith.constant 0 : index
    %c0_8 = arith.constant 0 : index
    %4 = vector.load %arg7[%c0_7, %c0_8] : memref<32x1xf32, #tpu.memory_space<vmem>>, vector<32x1xf32>
    %c0_9 = arith.constant 0 : index
    %c0_10 = arith.constant 0 : index
    %5 = vector.load %arg8[%c0_9, %c0_10] : memref<1x32xf32, #tpu.memory_space<vmem>>, vector<1x32xf32>
    %6 = vector.shape_cast %5 : vector<1x32xf32> to vector<1x32xf32>
    %7 = vector.broadcast %6 : vector<1x32xf32> to vector<8x32xf32>
    %c0_11 = arith.constant 0 : index
    %c0_12 = arith.constant 0 : index
    %c0_13 = arith.constant 0 : index
    %8 = vector.load %arg1[%c0_11, %c0_12, %c0_13] : memref<8x8x4xf32, #tpu.memory_space<vmem>>, vector<8x8x4xf32>
    %9 = vector.shape_cast %8 : vector<8x8x4xf32> to vector<64x4xf32>
    %c0_14 = arith.constant 0 : index
    %c0_15 = arith.constant 0 : index
    %c0_16 = arith.constant 0 : index
    %10 = vector.load %arg2[%c0_14, %c0_15, %c0_16] : memref<11x8x1xf32, #tpu.memory_space<vmem>>, vector<8x8x1xf32>
    %11 = vector.shape_cast %10 : vector<8x8x1xf32> to vector<64x1xf32>
    %cst = arith.constant dense<0.000000e+00> : vector<64x32xf32>
    %12 = tpu.matmul %9, %2, %cst {dimension_numbers = #tpu.dot_dimension_numbers<[1], [0], [0], [1], [0, 0, 1, 1], [], []>} : vector<64x4xf32>, vector<4x32xf32>, vector<64x32xf32> -> vector<64x32xf32>
    %13 = vector.shape_cast %12 : vector<64x32xf32> to vector<8x8x32xf32>
    %cst_17 = arith.constant dense<0.000000e+00> : vector<64x32xf32>
    %14 = tpu.matmul %11, %3, %cst_17 {dimension_numbers = #tpu.dot_dimension_numbers<[1], [0], [0], [1], [0, 0, 1, 1], [], []>} : vector<64x1xf32>, vector<1x32xf32>, vector<64x32xf32> -> vector<64x32xf32>
    %15 = vector.shape_cast %14 : vector<64x32xf32> to vector<8x8x32xf32>
    %16 = vector.extract_strided_slice %13 {offsets = [0, 0, 0], sizes = [1, 8, 32], strides = [1, 1, 1]} : vector<8x8x32xf32> to vector<1x8x32xf32>
    %17 = vector.shape_cast %16 : vector<1x8x32xf32> to vector<8x32xf32>
    %18 = arith.addf %17, %7 : vector<8x32xf32>
    %c0_18 = arith.constant 0 : index
    %c0_19 = arith.constant 0 : index
    %c0_20 = arith.constant 0 : index
    %19 = vector.load %arg11[%c0_18, %c0_19, %c0_20] : memref<9x8x32xf32, #tpu.memory_space<vmem>>, vector<1x8x32xf32>
    %20 = vector.shape_cast %19 : vector<1x8x32xf32> to vector<8x32xf32>
    %21 = vector.shape_cast %18 : vector<8x32xf32> to vector<1x8x32xf32>
    tpu.vector_store %arg11[%c0_18, %c0_19, %c0_20], %21 {strides = array<i32>} : memref<9x8x32xf32, #tpu.memory_space<vmem>>, vector<1x8x32xf32>,
    %22 = vector.extract_strided_slice %13 {offsets = [1, 0, 0], sizes = [7, 8, 32], strides = [1, 1, 1]} : vector<8x8x32xf32> to vector<7x8x32xf32>
    %23 = vector.extract_strided_slice %15 {offsets = [0, 0, 0], sizes = [7, 8, 32], strides = [1, 1, 1]} : vector<8x8x32xf32> to vector<7x8x32xf32>
    %24 = arith.subf %22, %23 : vector<7x8x32xf32>
    %25 = vector.shape_cast %7 : vector<8x32xf32> to vector<1x8x32xf32>
    %26 = vector.broadcast %25 : vector<1x8x32xf32> to vector<7x8x32xf32>
    %27 = arith.addf %24, %26 : vector<7x8x32xf32>
    %c1 = arith.constant 1 : index
    %c0_21 = arith.constant 0 : index
    %c0_22 = arith.constant 0 : index
    %28 = vector.load %arg11[%c1, %c0_21, %c0_22] : memref<9x8x32xf32, #tpu.memory_space<vmem>>, vector<7x8x32xf32>
    tpu.vector_store %arg11[%c1, %c0_21, %c0_22], %27 {strides = array<i32>} : memref<9x8x32xf32, #tpu.memory_space<vmem>>, vector<7x8x32xf32>,
    %29 = vector.extract_strided_slice %15 {offsets = [7, 0, 0], sizes = [1, 8, 32], strides = [1, 1, 1]} : vector<8x8x32xf32> to vector<1x8x32xf32>
    %30 = vector.shape_cast %29 : vector<1x8x32xf32> to vector<8x32xf32>
    %31 = arith.subf %7, %30 : vector<8x32xf32>
    %c8 = arith.constant 8 : index
    %c0_23 = arith.constant 0 : index
    %c0_24 = arith.constant 0 : index
    %32 = vector.load %arg11[%c8, %c0_23, %c0_24] : memref<9x8x32xf32, #tpu.memory_space<vmem>>, vector<1x8x32xf32>
    %33 = vector.shape_cast %32 : vector<1x8x32xf32> to vector<8x32xf32>
    %34 = vector.shape_cast %31 : vector<8x32xf32> to vector<1x8x32xf32>
    tpu.vector_store %arg11[%c8, %c0_23, %c0_24], %34 {strides = array<i32>} : memref<9x8x32xf32, #tpu.memory_space<vmem>>, vector<1x8x32xf32>,
    %c0_25 = arith.constant 0 : index
    %c0_26 = arith.constant 0 : index
    %35 = vector.load %arg9[%c0_25, %c0_26] : memref<1x32xf32, #tpu.memory_space<vmem>>, vector<1x32xf32>
    %36 = vector.shape_cast %35 : vector<1x32xf32> to vector<1x32xf32>
    %37 = vector.broadcast %36 : vector<1x32xf32> to vector<8x32xf32>
    %cst_27 = arith.constant dense<0.000000e+00> : vector<8x32xf32>
    %38 = tpu.matmul %37, %0, %cst_27 {dimension_numbers = #tpu.dot_dimension_numbers<[1], [0], [0], [1], [0, 0, 1, 1], [], []>} : vector<8x32xf32>, vector<32x32xf32>, vector<8x32xf32> -> vector<8x32xf32>
    %c0_28 = arith.constant 0 : index
    %c0_29 = arith.constant 0 : index
    %c0_30 = arith.constant 0 : index
    %39 = vector.load %arg11[%c0_28, %c0_29, %c0_30] : memref<9x8x32xf32, #tpu.memory_space<vmem>>, vector<1x8x32xf32>
    %40 = vector.shape_cast %39 : vector<1x8x32xf32> to vector<8x32xf32>
    %41 = arith.addf %38, %40 : vector<8x32xf32>
    %42 = math.tanh %41 : vector<8x32xf32>
    %c0_31 = arith.constant 0 : index
    %c0_32 = arith.constant 0 : index
    %c0_33 = arith.constant 0 : index
    %43 = vector.load %arg12[%c0_31, %c0_32, %c0_33] : memref<11x8x32xf32, #tpu.memory_space<vmem>>, vector<1x8x32xf32>
    %44 = vector.shape_cast %43 : vector<1x8x32xf32> to vector<8x32xf32>
    %45 = vector.shape_cast %42 : vector<8x32xf32> to vector<1x8x32xf32>
    tpu.vector_store %arg12[%c0_31, %c0_32, %c0_33], %45 {strides = array<i32>} : memref<11x8x32xf32, #tpu.memory_space<vmem>>, vector<1x8x32xf32>,
    %cst_34 = arith.constant dense<0.000000e+00> : vector<8x32xf32>
    %46 = tpu.matmul %42, %1, %cst_34 {dimension_numbers = #tpu.dot_dimension_numbers<[1], [0], [0], [1], [0, 0, 1, 1], [], []>} : vector<8x32xf32>, vector<32x32xf32>, vector<8x32xf32> -> vector<8x32xf32>
    %c1_35 = arith.constant 1 : index
    %c0_36 = arith.constant 0 : index
    %c0_37 = arith.constant 0 : index
    %47 = vector.load %arg11[%c1_35, %c0_36, %c0_37] : memref<9x8x32xf32, #tpu.memory_space<vmem>>, vector<1x8x32xf32>
    %48 = vector.shape_cast %47 : vector<1x8x32xf32> to vector<8x32xf32>
    %49 = arith.addf %46, %48 : vector<8x32xf32>
    %50 = math.tanh %49 : vector<8x32xf32>
    %c1_38 = arith.constant 1 : index
    %c0_39 = arith.constant 0 : index
    %c0_40 = arith.constant 0 : index
    %51 = vector.load %arg12[%c1_38, %c0_39, %c0_40] : memref<11x8x32xf32, #tpu.memory_space<vmem>>, vector<1x8x32xf32>
    %52 = vector.shape_cast %51 : vector<1x8x32xf32> to vector<8x32xf32>
    %53 = vector.shape_cast %50 : vector<8x32xf32> to vector<1x8x32xf32>
    tpu.vector_store %arg12[%c1_38, %c0_39, %c0_40], %53 {strides = array<i32>} : memref<11x8x32xf32, #tpu.memory_space<vmem>>, vector<1x8x32xf32>,
    %cst_41 = arith.constant dense<0.000000e+00> : vector<8x32xf32>
    %54 = tpu.matmul %50, %1, %cst_41 {dimension_numbers = #tpu.dot_dimension_numbers<[1], [0], [0], [1], [0, 0, 1, 1], [], []>} : vector<8x32xf32>, vector<32x32xf32>, vector<8x32xf32> -> vector<8x32xf32>
    %c2 = arith.constant 2 : index
    %c0_42 = arith.constant 0 : index
    %c0_43 = arith.constant 0 : index
    %55 = vector.load %arg11[%c2, %c0_42, %c0_43] : memref<9x8x32xf32, #tpu.memory_space<vmem>>, vector<1x8x32xf32>
    %56 = vector.shape_cast %55 : vector<1x8x32xf32> to vector<8x32xf32>
    %57 = arith.addf %54, %56 : vector<8x32xf32>
    %58 = math.tanh %57 : vector<8x32xf32>
    %c2_44 = arith.constant 2 : index
    %c0_45 = arith.constant 0 : index
    %c0_46 = arith.constant 0 : index
    %59 = vector.load %arg12[%c2_44, %c0_45, %c0_46] : memref<11x8x32xf32, #tpu.memory_space<vmem>>, vector<1x8x32xf32>
    %60 = vector.shape_cast %59 : vector<1x8x32xf32> to vector<8x32xf32>
    %61 = vector.shape_cast %58 : vector<8x32xf32> to vector<1x8x32xf32>
    tpu.vector_store %arg12[%c2_44, %c0_45, %c0_46], %61 {strides = array<i32>} : memref<11x8x32xf32, #tpu.memory_space<vmem>>, vector<1x8x32xf32>,
    %cst_47 = arith.constant dense<0.000000e+00> : vector<8x32xf32>
    %62 = tpu.matmul %58, %1, %cst_47 {dimension_numbers = #tpu.dot_dimension_numbers<[1], [0], [0], [1], [0, 0, 1, 1], [], []>} : vector<8x32xf32>, vector<32x32xf32>, vector<8x32xf32> -> vector<8x32xf32>
    %c3 = arith.constant 3 : index
    %c0_48 = arith.constant 0 : index
    %c0_49 = arith.constant 0 : index
    %63 = vector.load %arg11[%c3, %c0_48, %c0_49] : memref<9x8x32xf32, #tpu.memory_space<vmem>>, vector<1x8x32xf32>
    %64 = vector.shape_cast %63 : vector<1x8x32xf32> to vector<8x32xf32>
    %65 = arith.addf %62, %64 : vector<8x32xf32>
    %66 = math.tanh %65 : vector<8x32xf32>
    %c3_50 = arith.constant 3 : index
    %c0_51 = arith.constant 0 : index
    %c0_52 = arith.constant 0 : index
    %67 = vector.load %arg12[%c3_50, %c0_51, %c0_52] : memref<11x8x32xf32, #tpu.memory_space<vmem>>, vector<1x8x32xf32>
    %68 = vector.shape_cast %67 : vector<1x8x32xf32> to vector<8x32xf32>
    %69 = vector.shape_cast %66 : vector<8x32xf32> to vector<1x8x32xf32>
    tpu.vector_store %arg12[%c3_50, %c0_51, %c0_52], %69 {strides = array<i32>} : memref<11x8x32xf32, #tpu.memory_space<vmem>>, vector<1x8x32xf32>,
    %cst_53 = arith.constant dense<0.000000e+00> : vector<8x32xf32>
    %70 = tpu.matmul %66, %1, %cst_53 {dimension_numbers = #tpu.dot_dimension_numbers<[1], [0], [0], [1], [0, 0, 1, 1], [], []>} : vector<8x32xf32>, vector<32x32xf32>, vector<8x32xf32> -> vector<8x32xf32>
    %c4 = arith.constant 4 : index
    %c0_54 = arith.constant 0 : index
    %c0_55 = arith.constant 0 : index
    %71 = vector.load %arg11[%c4, %c0_54, %c0_55] : memref<9x8x32xf32, #tpu.memory_space<vmem>>, vector<1x8x32xf32>
    %72 = vector.shape_cast %71 : vector<1x8x32xf32> to vector<8x32xf32>
    %73 = arith.addf %70, %72 : vector<8x32xf32>
    %74 = math.tanh %73 : vector<8x32xf32>
    %c4_56 = arith.constant 4 : index
    %c0_57 = arith.constant 0 : index
    %c0_58 = arith.constant 0 : index
    %75 = vector.load %arg12[%c4_56, %c0_57, %c0_58] : memref<11x8x32xf32, #tpu.memory_space<vmem>>, vector<1x8x32xf32>
    %76 = vector.shape_cast %75 : vector<1x8x32xf32> to vector<8x32xf32>
    %77 = vector.shape_cast %74 : vector<8x32xf32> to vector<1x8x32xf32>
    tpu.vector_store %arg12[%c4_56, %c0_57, %c0_58], %77 {strides = array<i32>} : memref<11x8x32xf32, #tpu.memory_space<vmem>>, vector<1x8x32xf32>,
    %cst_59 = arith.constant dense<0.000000e+00> : vector<8x32xf32>
    %78 = tpu.matmul %74, %1, %cst_59 {dimension_numbers = #tpu.dot_dimension_numbers<[1], [0], [0], [1], [0, 0, 1, 1], [], []>} : vector<8x32xf32>, vector<32x32xf32>, vector<8x32xf32> -> vector<8x32xf32>
    %c5 = arith.constant 5 : index
    %c0_60 = arith.constant 0 : index
    %c0_61 = arith.constant 0 : index
    %79 = vector.load %arg11[%c5, %c0_60, %c0_61] : memref<9x8x32xf32, #tpu.memory_space<vmem>>, vector<1x8x32xf32>
    %80 = vector.shape_cast %79 : vector<1x8x32xf32> to vector<8x32xf32>
    %81 = arith.addf %78, %80 : vector<8x32xf32>
    %82 = math.tanh %81 : vector<8x32xf32>
    %c5_62 = arith.constant 5 : index
    %c0_63 = arith.constant 0 : index
    %c0_64 = arith.constant 0 : index
    %83 = vector.load %arg12[%c5_62, %c0_63, %c0_64] : memref<11x8x32xf32, #tpu.memory_space<vmem>>, vector<1x8x32xf32>
    %84 = vector.shape_cast %83 : vector<1x8x32xf32> to vector<8x32xf32>
    %85 = vector.shape_cast %82 : vector<8x32xf32> to vector<1x8x32xf32>
    tpu.vector_store %arg12[%c5_62, %c0_63, %c0_64], %85 {strides = array<i32>} : memref<11x8x32xf32, #tpu.memory_space<vmem>>, vector<1x8x32xf32>,
    %cst_65 = arith.constant dense<0.000000e+00> : vector<8x32xf32>
    %86 = tpu.matmul %82, %1, %cst_65 {dimension_numbers = #tpu.dot_dimension_numbers<[1], [0], [0], [1], [0, 0, 1, 1], [], []>} : vector<8x32xf32>, vector<32x32xf32>, vector<8x32xf32> -> vector<8x32xf32>
    %c6 = arith.constant 6 : index
    %c0_66 = arith.constant 0 : index
    %c0_67 = arith.constant 0 : index
    %87 = vector.load %arg11[%c6, %c0_66, %c0_67] : memref<9x8x32xf32, #tpu.memory_space<vmem>>, vector<1x8x32xf32>
    %88 = vector.shape_cast %87 : vector<1x8x32xf32> to vector<8x32xf32>
    %89 = arith.addf %86, %88 : vector<8x32xf32>
    %90 = math.tanh %89 : vector<8x32xf32>
    %c6_68 = arith.constant 6 : index
    %c0_69 = arith.constant 0 : index
    %c0_70 = arith.constant 0 : index
    %91 = vector.load %arg12[%c6_68, %c0_69, %c0_70] : memref<11x8x32xf32, #tpu.memory_space<vmem>>, vector<1x8x32xf32>
    %92 = vector.shape_cast %91 : vector<1x8x32xf32> to vector<8x32xf32>
    %93 = vector.shape_cast %90 : vector<8x32xf32> to vector<1x8x32xf32>
    tpu.vector_store %arg12[%c6_68, %c0_69, %c0_70], %93 {strides = array<i32>} : memref<11x8x32xf32, #tpu.memory_space<vmem>>, vector<1x8x32xf32>,
    %cst_71 = arith.constant dense<0.000000e+00> : vector<8x32xf32>
    %94 = tpu.matmul %90, %1, %cst_71 {dimension_numbers = #tpu.dot_dimension_numbers<[1], [0], [0], [1], [0, 0, 1, 1], [], []>} : vector<8x32xf32>, vector<32x32xf32>, vector<8x32xf32> -> vector<8x32xf32>
    %c7 = arith.constant 7 : index
    %c0_72 = arith.constant 0 : index
    %c0_73 = arith.constant 0 : index
    %95 = vector.load %arg11[%c7, %c0_72, %c0_73] : memref<9x8x32xf32, #tpu.memory_space<vmem>>, vector<1x8x32xf32>
    %96 = vector.shape_cast %95 : vector<1x8x32xf32> to vector<8x32xf32>
    %97 = arith.addf %94, %96 : vector<8x32xf32>
    %98 = math.tanh %97 : vector<8x32xf32>
    %c7_74 = arith.constant 7 : index
    %c0_75 = arith.constant 0 : index
    %c0_76 = arith.constant 0 : index
    %99 = vector.load %arg12[%c7_74, %c0_75, %c0_76] : memref<11x8x32xf32, #tpu.memory_space<vmem>>, vector<1x8x32xf32>
    %100 = vector.shape_cast %99 : vector<1x8x32xf32> to vector<8x32xf32>
    %101 = vector.shape_cast %98 : vector<8x32xf32> to vector<1x8x32xf32>
    tpu.vector_store %arg12[%c7_74, %c0_75, %c0_76], %101 {strides = array<i32>} : memref<11x8x32xf32, #tpu.memory_space<vmem>>, vector<1x8x32xf32>,
    %cst_77 = arith.constant dense<0.000000e+00> : vector<8x32xf32>
    %102 = tpu.matmul %98, %1, %cst_77 {dimension_numbers = #tpu.dot_dimension_numbers<[1], [0], [0], [1], [0, 0, 1, 1], [], []>} : vector<8x32xf32>, vector<32x32xf32>, vector<8x32xf32> -> vector<8x32xf32>
    %c8_78 = arith.constant 8 : index
    %c0_79 = arith.constant 0 : index
    %c0_80 = arith.constant 0 : index
    %103 = vector.load %arg11[%c8_78, %c0_79, %c0_80] : memref<9x8x32xf32, #tpu.memory_space<vmem>>, vector<1x8x32xf32>
    %104 = vector.shape_cast %103 : vector<1x8x32xf32> to vector<8x32xf32>
    %105 = arith.addf %102, %104 : vector<8x32xf32>
    %106 = math.tanh %105 : vector<8x32xf32>
    %c8_81 = arith.constant 8 : index
    %c0_82 = arith.constant 0 : index
    %c0_83 = arith.constant 0 : index
    %107 = vector.load %arg12[%c8_81, %c0_82, %c0_83] : memref<11x8x32xf32, #tpu.memory_space<vmem>>, vector<1x8x32xf32>
    %108 = vector.shape_cast %107 : vector<1x8x32xf32> to vector<8x32xf32>
    %109 = vector.shape_cast %106 : vector<8x32xf32> to vector<1x8x32xf32>
    tpu.vector_store %arg12[%c8_81, %c0_82, %c0_83], %109 {strides = array<i32>} : memref<11x8x32xf32, #tpu.memory_space<vmem>>, vector<1x8x32xf32>,
    %cst_84 = arith.constant dense<0.000000e+00> : vector<8x32xf32>
    %110 = tpu.matmul %106, %0, %cst_84 {dimension_numbers = #tpu.dot_dimension_numbers<[1], [0], [0], [1], [0, 0, 1, 1], [], []>} : vector<8x32xf32>, vector<32x32xf32>, vector<8x32xf32> -> vector<8x32xf32>
    %111 = arith.addf %110, %7 : vector<8x32xf32>
    %112 = math.tanh %111 : vector<8x32xf32>
    %c9 = arith.constant 9 : index
    %c0_85 = arith.constant 0 : index
    %c0_86 = arith.constant 0 : index
    %113 = vector.load %arg12[%c9, %c0_85, %c0_86] : memref<11x8x32xf32, #tpu.memory_space<vmem>>, vector<1x8x32xf32>
    %114 = vector.shape_cast %113 : vector<1x8x32xf32> to vector<8x32xf32>
    %115 = vector.shape_cast %112 : vector<8x32xf32> to vector<1x8x32xf32>
    tpu.vector_store %arg12[%c9, %c0_85, %c0_86], %115 {strides = array<i32>} : memref<11x8x32xf32, #tpu.memory_space<vmem>>, vector<1x8x32xf32>,
    %cst_87 = arith.constant dense<0.000000e+00> : vector<8x32xf32>
    %116 = tpu.matmul %112, %0, %cst_87 {dimension_numbers = #tpu.dot_dimension_numbers<[1], [0], [0], [1], [0, 0, 1, 1], [], []>} : vector<8x32xf32>, vector<32x32xf32>, vector<8x32xf32> -> vector<8x32xf32>
    %117 = arith.addf %116, %7 : vector<8x32xf32>
    %118 = math.tanh %117 : vector<8x32xf32>
    %c10 = arith.constant 10 : index
    %c0_88 = arith.constant 0 : index
    %c0_89 = arith.constant 0 : index
    %119 = vector.load %arg12[%c10, %c0_88, %c0_89] : memref<11x8x32xf32, #tpu.memory_space<vmem>>, vector<1x8x32xf32>
    %120 = vector.shape_cast %119 : vector<1x8x32xf32> to vector<8x32xf32>
    %121 = vector.shape_cast %118 : vector<8x32xf32> to vector<1x8x32xf32>
    tpu.vector_store %arg12[%c10, %c0_88, %c0_89], %121 {strides = array<i32>} : memref<11x8x32xf32, #tpu.memory_space<vmem>>, vector<1x8x32xf32>,
    %c0_90 = arith.constant 0 : index
    %c0_91 = arith.constant 0 : index
    %c0_92 = arith.constant 0 : index
    %122 = vector.load %arg12[%c0_90, %c0_91, %c0_92] : memref<11x8x32xf32, #tpu.memory_space<vmem>>, vector<11x8x32xf32>
    %123 = vector.shape_cast %122 : vector<11x8x32xf32> to vector<88x32xf32>
    %cst_93 = arith.constant dense<0.000000e+00> : vector<88x1xf32>
    %124 = tpu.matmul %123, %4, %cst_93 {dimension_numbers = #tpu.dot_dimension_numbers<[1], [0], [0], [1], [0, 0, 1, 1], [], []>} : vector<88x32xf32>, vector<32x1xf32>, vector<88x1xf32> -> vector<88x1xf32>
    %125 = vector.shape_cast %124 : vector<88x1xf32> to vector<11x8x1xf32>
    %c0_94 = arith.constant 0 : index
    %c0_95 = arith.constant 0 : index
    %c0_96 = arith.constant 0 : index
    %126 = vector.load %arg2[%c0_94, %c0_95, %c0_96] : memref<11x8x1xf32, #tpu.memory_space<vmem>>, vector<11x8x1xf32>
    %127 = arith.subf %125, %126 : vector<11x8x1xf32>
    %c0_97 = arith.constant 0 : index
    %c0_98 = arith.constant 0 : index
    %c0_99 = arith.constant 0 : index
    %128 = vector.load %arg10[%c0_97, %c0_98, %c0_99] : memref<11x8x1xf32, #tpu.memory_space<vmem>>, vector<11x8x1xf32>
    tpu.vector_store %arg10[%c0_97, %c0_98, %c0_99], %127 {strides = array<i32>} : memref<11x8x1xf32, #tpu.memory_space<vmem>>, vector<11x8x1xf32>,
    return
  }
  func.func @transform_0(%arg0: i32) -> (i32, i32, i32) {
    %c0_i32 = arith.constant 0 : i32
    %c0_i32_0 = arith.constant 0 : i32
    %c0_i32_1 = arith.constant 0 : i32
    return %c0_i32, %arg0, %c0_i32_0 : i32, i32, i32
  }
  func.func @transform_1(%arg0: i32) -> (i32, i32, i32) {
    %c0_i32 = arith.constant 0 : i32
    %c0_i32_0 = arith.constant 0 : i32
    %c0_i32_1 = arith.constant 0 : i32
    return %c0_i32, %arg0, %c0_i32_0 : i32, i32, i32
  }
  func.func @transform_2(%arg0: i32) -> (i32, i32) {
    %c0_i32 = arith.constant 0 : i32
    %c0_i32_0 = arith.constant 0 : i32
    %c0_i32_1 = arith.constant 0 : i32
    return %c0_i32, %c0_i32_0 : i32, i32
  }
  func.func @transform_3(%arg0: i32) -> (i32, i32) {
    %c0_i32 = arith.constant 0 : i32
    %c0_i32_0 = arith.constant 0 : i32
    %c0_i32_1 = arith.constant 0 : i32
    return %c0_i32, %c0_i32_0 : i32, i32
  }
  func.func @transform_4(%arg0: i32) -> (i32, i32) {
    %c0_i32 = arith.constant 0 : i32
    %c0_i32_0 = arith.constant 0 : i32
    %c0_i32_1 = arith.constant 0 : i32
    return %c0_i32, %c0_i32_0 : i32, i32
  }
  func.func @transform_5(%arg0: i32) -> (i32, i32) {
    %c0_i32 = arith.constant 0 : i32
    %c0_i32_0 = arith.constant 0 : i32
    %c0_i32_1 = arith.constant 0 : i32
    return %c0_i32, %c0_i32_0 : i32, i32
  }
  func.func @transform_6(%arg0: i32) -> (i32, i32) {
    %c0_i32 = arith.constant 0 : i32
    %c0_i32_0 = arith.constant 0 : i32
    %c0_i32_1 = arith.constant 0 : i32
    return %c0_i32, %c0_i32_0 : i32, i32
  }
  func.func @transform_7(%arg0: i32) -> (i32, i32) {
    %c0_i32 = arith.constant 0 : i32
    %c0_i32_0 = arith.constant 0 : i32
    %c0_i32_1 = arith.constant 0 : i32
    return %c0_i32, %c0_i32_0 : i32, i32
  }
  func.func @transform_8(%arg0: i32) -> (i32, i32) {
    %c0_i32 = arith.constant 0 : i32
    %c0_i32_0 = arith.constant 0 : i32
    %c0_i32_1 = arith.constant 0 : i32
    return %c0_i32, %c0_i32_0 : i32, i32
  }
  func.func @transform_9(%arg0: i32) -> (i32, i32, i32) {
    %c0_i32 = arith.constant 0 : i32
    %c0_i32_0 = arith.constant 0 : i32
    %c0_i32_1 = arith.constant 0 : i32
    return %c0_i32, %arg0, %c0_i32_0 : i32, i32, i32
  }
}

</mosaic_0001>

<bundles_post_ra>
// kernel: ecnn_forward.1
= control target key start
LH: loop header
LB: loop body
LE: loop exit
PB: predicated region body
PF: predicated region fallthrough
CT: control target
= control target key end

     0   :  { %vm94_vm0 = vcmask 1043456   ;;  %vm228_vm1 = vcmask 1040384   ;;  %vm69_vm2 = vcmask 31744   ;;  %vm203_vm3 = vcmask 7168   ;;  %s2251_s4 = inlined_call_operand.vmem [shape: f32[4,32], index: 4, kind: input, shape index: {}]   ;;  %s2252_s5 = inlined_call_operand.vmem [shape: f32[1,32], index: 5, kind: input, shape index: {}]   ;;  %s2253_s0 = inlined_call_operand.vmem [shape: f32[8,8,4], index: 0, kind: input, shape index: {}]   ;;  %s2254_s1 = inlined_call_operand.vmem [shape: f32[11,8,1], index: 1, kind: input, shape index: {}]   ;;  %s2255_s2 = inlined_call_operand.vmem [shape: f32[32,32], index: 2, kind: input, shape index: {}]   ;;  %s2256_s8 = inlined_call_operand.vmem [shape: f32[1,32], index: 8, kind: input, shape index: {}]   ;;  %s2257_s3 = inlined_call_operand.vmem [shape: f32[32,32], index: 3, kind: input, shape index: {}]   ;;  %s2258_s7 = inlined_call_operand.vmem [shape: f32[1,32], index: 7, kind: input, shape index: {}]   ;;  %s2259_s6 = inlined_call_operand.vmem [shape: f32[32,1], index: 6, kind: input, shape index: {}]   ;;  %s2260_s9 = inlined_call_operand.vmem [shape: f32[11,8,1], index: 9, kind: output, shape index: {}]  }
   0x1   :  { %v40_v0 = vld [vmem:[%s2251_s4] sm:$0xf]  ;;  %v54_v4 = vld [vmem:[%s2253_s0 + $0x8] sm:$0xff]  ;;  %v55_v8 = vld [vmem:[%s2253_s0 + $0x10] sm:$0xff]  ;;  %v1842_v12 = vmov 0.0|0.0   ;;  %vm1843_vm4 = vmmov 0  }
   0x2   :  { %v41_v1 = vld [vmem:[%s2252_s5] sm:$0x1]  ;;  %1551 = vmatprep.subr.msk.mxu0 %vm94_vm0, %v40_v0  ;;  %v1917_v5 = vld [vmem:[%s2254_s1 + $0x8] sm:$0xff]  ;;  %v1938_v10 = vld [vmem:[%s2254_s1 + $0x10] sm:$0xff]  ;;  %v1844_v25 = vmov 0.0   ;;  %vm338_vm5 = vcmask 261120  }
   0x3   :  { %v53_v2 = vld [vmem:[%s2253_s0] sm:$0xff]  ;;  %1565 = vmatprep.subr.msk.mxu1 %vm228_vm1, %v41_v1  ;;  %1552 = vmatpush3.msk.msra.mxu0 %vm94_vm0, %v40_v0  ;;  %v33_v7 = vld [vmem:[%s2255_s2 + $0x8] sm:$0xff]  ;;  %v56_v11 = vld [vmem:[%s2253_s0 + $0x18] sm:$0xff] }
   0x4   :  { %v1909_v3 = vld [vmem:[%s2254_s1] sm:$0xff]  ;;  %1553 = vmatprep.mubr.msk.f32.mxu0 %vm69_vm2, %v53_v2  ;;  %1566 = vmatpush3.msk.msra.mxu1 %vm228_vm1, %v41_v1  ;;  %v1951_v13 = vld [vmem:[%s2254_s1 + $0x18] sm:$0xff]  ;;  %v34_v14 = vld [vmem:[%s2255_s2 + $0x10] sm:$0xff] }
   0x5   :  { %v32_v6 = vld [vmem:[%s2255_s2] sm:$0xff]  ;;  %1567 = vmatprep.mubr.msk.f32.mxu1 %vm203_vm3, %v1909_v3  ;;  %1554 = vmatmul.mubr.msk.f32.vlgmr.msra.gmra.mrb[0].mxu0 %vm69_vm2, %v54_v4  ;;  %v35_v15 = vld [vmem:[%s2255_s2 + $0x18] sm:$0xff]  ;;  %v58_v19 = vld [vmem:[%s2253_s0 + $0x28] sm:$0xff] }
   0x6   :  { %v1933_v9 = vpack.c.bf16 %v33_v7, %v32_v6  ;;  %1568 = vmatmul.mubr.msk.f32.vlgmr.msra.gmra.mrb[0].mxu1 %vm203_vm3, %v1917_v5  ;;  %1741 = vmatprep.subr.bf16.mxu0 %v1842_v12  ;;  %v57_v16 = vld [vmem:[%s2253_s0 + $0x20] sm:$0xff]  ;;  %v1970_v18 = vpack.c.bf16 %v35_v15, %v34_v14  ;;  %v1986_v20 = vld [vmem:[%s2254_s1 + $0x28] sm:$0xff]  ;;  %v59_v21 = vld [vmem:[%s2253_s0 + $0x30] sm:$0xff] }
   0x7   :  { %1556 = vmatprep.mubr.msk.f32.mxu0 %vm69_vm2, %v55_v8  ;;  %1570 = vmatprep.mubr.msk.f32.mxu1 %vm203_vm3, %v1938_v10  ;;  %v1968_v17 = vld [vmem:[%s2254_s1 + $0x20] sm:$0xff]  ;;  %v1995_v22 = vld [vmem:[%s2254_s1 + $0x30] sm:$0xff]  ;;  %v60_v23 = vld [vmem:[%s2253_s0 + $0x38] sm:$0xff] }
   0x8   :  { %1743 = vmatpush3.bf16.msra.mxu0 %v1933_v9  ;;  %1747 = vmatprep.subr.bf16.mxu1 %v1842_v12  ;;  %v2010_v24 = vld [vmem:[%s2254_s1 + $0x38] sm:$0xff]  ;;  %v1440_v26 = vld [vmem:[%s2256_s8] ss:$0 sm:$0xff]  ;;  %v37_v28 = vld [vmem:[%s2257_s3 + $0x8] sm:$0xff] }
   0x9   :  { %1744 = vmatprep.subr.bf16.mxu0 %v1842_v12  ;;  %1557 = vmatmul.mubr.msk.f32.gmra.mrb[2].mxu0 %vm69_vm2, %v56_v11  ;;  %v36_v27 = vld [vmem:[%s2257_s3] sm:$0xff]  ;;  %v38_v30 = vld [vmem:[%s2257_s3 + $0x10] sm:$0xff]  ;;  %v39_v31 = vld [vmem:[%s2257_s3 + $0x18] sm:$0xff] }
   0xa   :  { %1571 = vmatmul.mubr.msk.f32.gmra.mrb[2].mxu1 %vm203_vm3, %v1951_v13  ;;  %1559 = vmatprep.mubr.msk.f32.mxu0 %vm69_vm2, %v57_v16  ;;  %v2031_v29 = vpack.c.bf16 %v37_v28, %v36_v27  ;;  %v2043_v32 = vpack.c.bf16 %v39_v31, %v38_v30  ;;  %v2052_v33 = vld [vmem:[%s2258_s7] ss:$0 sm:$0xff] }
   0xb   :  { %1573 = vmatprep.mubr.msk.f32.mxu1 %vm203_vm3, %v1968_v17 }
   0xc   :  { %1746 = vmatpush3.bf16.msra.mxu0 %v1970_v18  ;;  %1749 = vmatpush3.bf16.msra.mxu1 %v2031_v29 }
   0xd   :  { %1753 = vmatprep.subr.bf16.mxu0 %v1842_v12  ;;  %1560 = vmatmul.mubr.msk.f32.gmra.mrb[4].mxu0 %vm69_vm2, %v58_v19 }
   0xe   :  { %1574 = vmatmul.mubr.msk.f32.gmra.mrb[4].mxu1 %vm203_vm3, %v1986_v20  ;;  %1562 = vmatprep.mubr.msk.f32.mxu0 %vm69_vm2, %v59_v21 }
   0xf   :  { %1576 = vmatprep.mubr.msk.f32.mxu1 %vm203_vm3, %v1995_v22  ;;  %1750 = vmatprep.subr.bf16.mxu1 %v1842_v12 }
  0x10   :  { %1752 = vmatpush3.bf16.msra.mxu1 %v2043_v32 }
  0x11   :  { %1563 = vmatmul.mubr.msk.f32.gmra.mrb[6].mxu0 %vm69_vm2, %v60_v23  ;;  %1759 = vmatprep.subr.bf16.mxu1 %v1842_v12 }
  0x12   :  { %1577 = vmatmul.mubr.msk.f32.gmra.mrb[6].mxu1 %vm203_vm3, %v2010_v24  ;;  %1587 = vmatprep.mubr.msk.f32.mxu0 %vm1843_vm4, %v1844_v25 }
  0x13   :  { %1598 = vmatprep.mubr.msk.f32.mxu1 %vm1843_vm4, %v1844_v25 }
  0x15   :  { %1588 = vmatmul.mubr.msk.f32.vlgmr.msra.gmra.mrb[8].mxu0 %vm338_vm5, %v1440_v26 }
  0x16   :  { %1609 = vmatprep.mubr.msk.f32.mxu0 %vm1843_vm4, %v1844_v25  ;;  %1755 = vmatpush3.bf16.msra.mxu0 %v2031_v29 }
  0x17   :  { %1756 = vmatprep.subr.bf16.mxu0 %v1842_v12 }
  0x1a   :  { %1758 = vmatpush3.bf16.msra.mxu0 %v2043_v32 }
  0x1b   :  { %1765 = vmatprep.subr.bf16.mxu0 %v1842_v12 }
  0xd8   :  { %v1555_v34 = vpop.f32.mrb[0].mxu0 }
  0xd9   :  { %v1569_v35 = vpop.f32.mrb[0].mxu1  ;;  %v164_v36 = vpop.f32.mrb[1].mxu0 }
  0xda   :  { %v298_v37 = vpop.f32.mrb[1].mxu1  ;;  %v337_v38 = vadd.f32 %v2052_v33, %v164_v36 }
  0xdb   :  { %v340_v39 = vsub.f32 %v1555_v34, %v298_v37 }
  0xdc   :  { %339 = vst.msk [vmem:[#allocation2] sm:$0xff] %vm338_vm5, %v337_v38  ;;  %v1558_v41 = vpop.f32.mrb[2].mxu0 }
  0xdd   :  { %v347_v40 = vadd.f32 %v2052_v33, %v340_v39  ;;  %v1572_v42 = vpop.f32.mrb[2].mxu1  ;;  %v174_v43 = vpop.f32.mrb[3].mxu0 }
  0xde   :  { %v308_v44 = vpop.f32.mrb[3].mxu1  ;;  %v341_v45 = vsub.f32 %v174_v43, %v1569_v35 }
  0xdf   :  { %355 = vst.msk [vmem:[#allocation2 + $0x8] sm:$0xff] %vm338_vm5, %v347_v40  ;;  %v342_v46 = vsub.f32 %v1558_v41, %v308_v44 }
  0xe0   :  { %v348_v47 = vadd.f32 %v2052_v33, %v341_v45  ;;  %v1561_v49 = vpop.f32.mrb[4].mxu0 }
  0xe1   :  { %v349_v48 = vadd.f32 %v2052_v33, %v342_v46  ;;  %v1575_v50 = vpop.f32.mrb[4].mxu1  ;;  %v184_v51 = vpop.f32.mrb[5].mxu0 }
  0xe2   :  { %v318_v52 = vpop.f32.mrb[5].mxu1  ;;  %356 = vst.msk [vmem:[#allocation2 + $0x10] sm:$0xff] %vm338_vm5, %v348_v47  ;;  %v343_v53 = vsub.f32 %v184_v51, %v1572_v42 }
  0xe3   :  { %357 = vst.msk [vmem:[#allocation2 + $0x18] sm:$0xff] %vm338_vm5, %v349_v48  ;;  %v344_v54 = vsub.f32 %v1561_v49, %v318_v52  ;;  %v371_v2 = vld [vmem:[#allocation2] sm:$0xff] }
  0xe4   :  { %v350_v55 = vadd.f32 %v2052_v33, %v343_v53  ;;  %v1564_v57 = vpop.f32.mrb[6].mxu0 }
  0xe5   :  { %v351_v56 = vadd.f32 %v2052_v33, %v344_v54  ;;  %v1578_v58 = vpop.f32.mrb[6].mxu1  ;;  %v194_v60 = vpop.f32.mrb[7].mxu0 }
  0xe6   :  { %v362_v59 = vsub.f32 %v2052_v33, %v1578_v58  ;;  %v328_v61 = vpop.f32.mrb[7].mxu1  ;;  %358 = vst.msk [vmem:[#allocation2 + $0x20] sm:$0xff] %vm338_vm5, %v350_v55  ;;  %v345_v62 = vsub.f32 %v194_v60, %v1575_v50  ;;  %v446_v11 = vld [vmem:[#allocation2 + $0x8] sm:$0xff] }
  0xe7   :  { %359 = vst.msk [vmem:[#allocation2 + $0x28] sm:$0xff] %vm338_vm5, %v351_v56  ;;  %v346_v63 = vsub.f32 %v1564_v57, %v328_v61  ;;  %v45_v61 = vld [vmem:[%s2259_s6 + $0x18] sm:$0xff] }
  0xe8   :  { %364 = vst.msk [vmem:[#allocation2 + $0x40] sm:$0xff] %vm338_vm5, %v362_v59  ;;  %v352_v0 = vadd.f32 %v2052_v33, %v345_v62  ;;  %v440_v4 = vpop.f32.mrb[8].mxu0  ;;  %v42_v59 = vld [vmem:[%s2259_s6] sm:$0xff] }
  0xe9   :  { %v353_v1 = vadd.f32 %v2052_v33, %v346_v63  ;;  %v441_v6 = vadd.f32 %v440_v4, %v371_v2  ;;  %v1589_v7 = vpop.f32.mrb[9].mxu0  ;;  %v524_v21 = vld [vmem:[#allocation2 + $0x10] sm:$0xff] }
  0xea   :  { %360 = vst.msk [vmem:[#allocation2 + $0x30] sm:$0xff] %vm338_vm5, %v352_v0  ;;  %v602_v30 = vld [vmem:[#allocation2 + $0x18] sm:$0xff] }
  0xeb   :  { %361 = vst.msk [vmem:[#allocation2 + $0x38] sm:$0xff] %vm338_vm5, %v353_v1  ;;  %1820 = vtanh.f32 %v441_v6 }
  0xed   :  { %v680_v37 = vld [vmem:[#allocation2 + $0x20] sm:$0xff] }
  0xee   :  { %v758_v42 = vld [vmem:[#allocation2 + $0x28] sm:$0xff] }
  0xef   :  { %v991_v55 = vld [vmem:[#allocation2 + $0x40] sm:$0xff] }
  0xf1   :  { %v836_v47 = vld [vmem:[#allocation2 + $0x30] sm:$0xff] }
  0xf5   :  { %v1821_v8 = vpop.eup %1820 }
  0xf6   :  { %445 = vst.msk [vmem:[#allocation3] sm:$0xff] %vm338_vm5, %v1821_v8  ;;  %1599 = vmatmul.mubr.msk.f32.vlgmr.msra.gmra.mrb[8].mxu1 %vm338_vm5, %v1821_v8 }
  0xf7   :  { %1761 = vmatpush3.bf16.msra.mxu1 %v2031_v29  ;;  %1620 = vmatprep.mubr.msk.f32.mxu1 %vm1843_vm4, %v1844_v25 }
  0xf8   :  { %1762 = vmatprep.subr.bf16.mxu1 %v1842_v12 }
  0xfb   :  { %1764 = vmatpush3.bf16.msra.mxu1 %v2043_v32 }
  0xfc   :  { %1771 = vmatprep.subr.bf16.mxu1 %v1842_v12 }
 0x1c9   :  { %v516_v14 = vpop.f32.mrb[8].mxu1 }
 0x1ca   :  { %v517_v15 = vadd.f32 %v516_v14, %v446_v11  ;;  %v1600_v16 = vpop.f32.mrb[9].mxu1 }
 0x1cc   :  { %1822 = vtanh.f32 %v517_v15 }
 0x1d6   :  { %v1823_v19 = vpop.eup %1822 }
 0x1d7   :  { %522 = vst.msk [vmem:[#allocation3 + $0x8] sm:$0xff] %vm338_vm5, %v1823_v19  ;;  %1610 = vmatmul.mubr.msk.f32.vlgmr.msra.gmra.mrb[10].mxu0 %vm338_vm5, %v1823_v19 }
 0x1d8   :  { %1767 = vmatpush3.bf16.msra.mxu0 %v2031_v29  ;;  %1631 = vmatprep.mubr.msk.f32.mxu0 %vm1843_vm4, %v1844_v25 }
 0x1d9   :  { %1768 = vmatprep.subr.bf16.mxu0 %v1842_v12 }
 0x1dc   :  { %1770 = vmatpush3.bf16.msra.mxu0 %v2043_v32 }
 0x1dd   :  { %1777 = vmatprep.subr.bf16.mxu0 %v1842_v12 }
 0x2aa   :  { %v594_v23 = vpop.f32.mrb[10].mxu0 }
 0x2ab   :  { %v595_v26 = vadd.f32 %v594_v23, %v524_v21  ;;  %v1611_v27 = vpop.f32.mrb[11].mxu0 }
 0x2ad   :  { %1824 = vtanh.f32 %v595_v26 }
 0x2b7   :  { %v1825_v28 = vpop.eup %1824 }
 0x2b8   :  { %600 = vst.msk [vmem:[#allocation3 + $0x10] sm:$0xff] %vm338_vm5, %v1825_v28  ;;  %1621 = vmatmul.mubr.msk.f32.vlgmr.msra.gmra.mrb[10].mxu1 %vm338_vm5, %v1825_v28 }
 0x2b9   :  { %1773 = vmatpush3.bf16.msra.mxu1 %v2031_v29  ;;  %1642 = vmatprep.mubr.msk.f32.mxu1 %vm1843_vm4, %v1844_v25 }
 0x2ba   :  { %1774 = vmatprep.subr.bf16.mxu1 %v1842_v12 }
 0x2bd   :  { %1776 = vmatpush3.bf16.msra.mxu1 %v2043_v32 }
 0x2be   :  { %1783 = vmatprep.subr.bf16.mxu1 %v1842_v12 }
 0x38b   :  { %v672_v31 = vpop.f32.mrb[10].mxu1 }
 0x38c   :  { %v673_v34 = vadd.f32 %v672_v31, %v602_v30  ;;  %v1622_v35 = vpop.f32.mrb[11].mxu1 }
 0x38e   :  { %1826 = vtanh.f32 %v673_v34  ;;  %v1220_v34 = vld [vmem:[#allocation3] sm:$0xff] }
 0x398   :  { %v1827_v36 = vpop.eup %1826 }
 0x399   :  { %678 = vst.msk [vmem:[#allocation3 + $0x18] sm:$0xff] %vm338_vm5, %v1827_v36  ;;  %1632 = vmatmul.mubr.msk.f32.vlgmr.msra.gmra.mrb[12].mxu0 %vm338_vm5, %v1827_v36 }
 0x39a   :  { %1779 = vmatpush3.bf16.msra.mxu0 %v2031_v29  ;;  %1653 = vmatprep.mubr.msk.f32.mxu0 %vm1843_vm4, %v1844_v25 }
 0x39b   :  { %1780 = vmatprep.subr.bf16.mxu0 %v1842_v12 }
 0x39e   :  { %1782 = vmatpush3.bf16.msra.mxu0 %v2043_v32 }
 0x39f   :  { %1789 = vmatprep.subr.bf16.mxu0 %v1842_v12 }
 0x46c   :  { %v750_v38 = vpop.f32.mrb[12].mxu0 }
 0x46d   :  { %v751_v39 = vadd.f32 %v750_v38, %v680_v37  ;;  %v1633_v40 = vpop.f32.mrb[13].mxu0  ;;  %v1221_v37 = vld [vmem:[#allocation3 + $0x8] sm:$0xff]  ;;  %v1222_v38 = vld [vmem:[#allocation3 + $0x10] sm:$0xff] }
 0x46f   :  { %1828 = vtanh.f32 %v751_v39  ;;  %v1223_v39 = vld [vmem:[#allocation3 + $0x18] sm:$0xff] }
 0x479   :  { %v1829_v41 = vpop.eup %1828 }
 0x47a   :  { %756 = vst.msk [vmem:[#allocation3 + $0x20] sm:$0xff] %vm338_vm5, %v1829_v41  ;;  %1643 = vmatmul.mubr.msk.f32.vlgmr.msra.gmra.mrb[12].mxu1 %vm338_vm5, %v1829_v41 }
 0x47b   :  { %1785 = vmatpush3.bf16.msra.mxu1 %v2031_v29  ;;  %1664 = vmatprep.mubr.msk.f32.mxu1 %vm1843_vm4, %v1844_v25 }
 0x47c   :  { %1786 = vmatprep.subr.bf16.mxu1 %v1842_v12 }
 0x47f   :  { %1788 = vmatpush3.bf16.msra.mxu1 %v2043_v32 }
 0x480   :  { %1795 = vmatprep.subr.bf16.mxu1 %v1842_v12 }
 0x481   :  { %v1224_v0 = vld [vmem:[#allocation3 + $0x20] sm:$0xff] }
 0x54d   :  { %v828_v43 = vpop.f32.mrb[12].mxu1 }
 0x54e   :  { %v829_v44 = vadd.f32 %v828_v43, %v758_v42  ;;  %v1644_v45 = vpop.f32.mrb[13].mxu1  ;;  %v1393_v43 = vld [vmem:[%s2254_s1 + $0x48] sm:$0xff] }
 0x550   :  { %1830 = vtanh.f32 %v829_v44 }
 0x55a   :  { %v1831_v46 = vpop.eup %1830 }
 0x55b   :  { %834 = vst.msk [vmem:[#allocation3 + $0x28] sm:$0xff] %vm338_vm5, %v1831_v46  ;;  %1654 = vmatmul.mubr.msk.f32.vlgmr.msra.gmra.mrb[14].mxu0 %vm338_vm5, %v1831_v46 }
 0x55c   :  { %1791 = vmatpush3.bf16.msra.mxu0 %v2031_v29  ;;  %1675 = vmatprep.mubr.msk.f32.mxu0 %vm1843_vm4, %v1844_v25  ;;  %v914_v29 = vld [vmem:[#allocation2 + $0x38] sm:$0xff] }
 0x55d   :  { %1792 = vmatprep.subr.bf16.mxu0 %v1842_v12 }
 0x560   :  { %1794 = vmatpush3.bf16.msra.mxu0 %v2043_v32 }
 0x561   :  { %1801 = vmatprep.subr.bf16.mxu0 %v1842_v12 }
 0x562   :  { %v1225_v1 = vld [vmem:[#allocation3 + $0x28] sm:$0xff] }
 0x62e   :  { %v906_v48 = vpop.f32.mrb[14].mxu0 }
 0x62f   :  { %v907_v49 = vadd.f32 %v906_v48, %v836_v47  ;;  %v1655_v50 = vpop.f32.mrb[15].mxu0 }
 0x631   :  { %1832 = vtanh.f32 %v907_v49 }
 0x63b   :  { %v1833_v51 = vpop.eup %1832 }
 0x63c   :  { %912 = vst.msk [vmem:[#allocation3 + $0x30] sm:$0xff] %vm338_vm5, %v1833_v51  ;;  %1665 = vmatmul.mubr.msk.f32.vlgmr.msra.gmra.mrb[14].mxu1 %vm338_vm5, %v1833_v51 }
 0x63d   :  { %1797 = vmatpush3.bf16.msra.mxu1 %v1933_v9  ;;  %1686 = vmatprep.mubr.msk.f32.mxu1 %vm1843_vm4, %v1844_v25 }
 0x63e   :  { %1798 = vmatprep.subr.bf16.mxu1 %v1842_v12 }
 0x641   :  { %1800 = vmatpush3.bf16.msra.mxu1 %v1970_v18 }
 0x642   :  { %1813 = vmatprep.subr.bf16.mxu1 %v1842_v12 }
 0x643   :  { %v1226_v2 = vld [vmem:[#allocation3 + $0x30] sm:$0xff] }
 0x70f   :  { %v984_v32 = vpop.f32.mrb[14].mxu1 }
 0x710   :  { %v985_v52 = vadd.f32 %v984_v32, %v914_v29  ;;  %v1666_v53 = vpop.f32.mrb[15].mxu1 }
 0x712   :  { %1834 = vtanh.f32 %v985_v52 }
 0x71c   :  { %v1835_v54 = vpop.eup %1834 }
 0x71d   :  { %990 = vst.msk [vmem:[#allocation3 + $0x38] sm:$0xff] %vm338_vm5, %v1835_v54  ;;  %1676 = vmatmul.mubr.msk.f32.vlgmr.msra.gmra.mrb[16].mxu0 %vm338_vm5, %v1835_v54 }
 0x71e   :  { %1803 = vmatpush3.bf16.msra.mxu0 %v1933_v9  ;;  %1697 = vmatprep.mubr.msk.f32.mxu0 %vm1843_vm4, %v1844_v25  ;;  %v43_v9 = vld [vmem:[%s2259_s6 + $0x8] sm:$0xff] }
 0x71f   :  { %1804 = vmatprep.subr.bf16.mxu0 %v1842_v12  ;;  %v1808_v60 = vpack.c.bf16 %v43_v9, %v42_v59 }
 0x722   :  { %1806 = vmatpush3.bf16.msra.mxu0 %v1970_v18  ;;  %v44_v18 = vld [vmem:[%s2259_s6 + $0x10] sm:$0xff] }
 0x723   :  { %1807 = vmatprep.subr.bf16.mxu0 %v1842_v12  ;;  %v1811_v63 = vpack.c.bf16 %v45_v61, %v44_v18 }
 0x724   :  { %v1227_v4 = vld [vmem:[#allocation3 + $0x38] sm:$0xff] }
 0x7f0   :  { %v1061_v56 = vpop.f32.mrb[16].mxu0 }
 0x7f1   :  { %v1062_v57 = vadd.f32 %v1061_v56, %v991_v55  ;;  %v1677_v58 = vpop.f32.mrb[17].mxu0 }
 0x7f3   :  { %1836 = vtanh.f32 %v1062_v57 }
 0x7fd   :  { %v1837_v62 = vpop.eup %1836 }
 0x7fe   :  { %1067 = vst.msk [vmem:[#allocation3 + $0x40] sm:$0xff] %vm338_vm5, %v1837_v62  ;;  %1687 = vmatmul.mubr.msk.f32.vlgmr.msra.gmra.mrb[16].mxu1 %vm338_vm5, %v1837_v62 }
 0x7ff   :  { %1815 = vmatpush3.bf16.msra.mxu1 %v1808_v60  ;;  %1720 = vmatprep.mubr.msk.f32.mxu1 %vm1843_vm4, %v1844_v25 }
 0x800   :  { %1814 = vmatprep.subr.bf16.mxu1 %v1842_v12 }
 0x803   :  { %1816 = vmatpush3.bf16.msra.mxu1 %v1811_v63 }
 0x805   :  { %v1228_v6 = vld [vmem:[#allocation3 + $0x40] sm:$0xff] }
 0x806   :  { %1721 = vmatmul.mubr.msk.f32.vlgmr.msra.gmra.mrb[18].mxu1 %vm338_vm5, %v1224_v0 }
 0x807   :  { %1723 = vmatprep.mubr.msk.f32.mxu1 %vm1843_vm4, %v1844_v25 }
 0x80a   :  { %1724 = vmatmul.mubr.msk.f32.gmra.mrb[20].mxu1 %vm338_vm5, %v1225_v1 }
 0x80b   :  { %1726 = vmatprep.mubr.msk.f32.mxu1 %vm1843_vm4, %v1844_v25 }
 0x80e   :  { %1727 = vmatmul.mubr.msk.f32.gmra.mrb[22].mxu1 %vm338_vm5, %v1226_v2 }
 0x80f   :  { %1729 = vmatprep.mubr.msk.f32.mxu1 %vm1843_vm4, %v1844_v25 }
 0x812   :  { %1730 = vmatmul.mubr.msk.f32.gmra.mrb[24].mxu1 %vm338_vm5, %v1227_v4 }
 0x813   :  { %1732 = vmatprep.mubr.msk.f32.mxu1 %vm1843_vm4, %v1844_v25 }
 0x816   :  { %1733 = vmatmul.mubr.msk.f32.gmra.mrb[26].mxu1 %vm338_vm5, %v1228_v6 }
 0x817   :  { %1735 = vmatprep.mubr.msk.f32.mxu1 %vm1843_vm4, %v1844_v25 }
 0x8d1   :  { %v1137_v7 = vpop.f32.mrb[16].mxu1 }
 0x8d2   :  { %v1138_v8 = vadd.f32 %v2052_v33, %v1137_v7  ;;  %v1688_v11 = vpop.f32.mrb[17].mxu1 }
 0x8d4   :  { %1838 = vtanh.f32 %v1138_v8 }
 0x8d9   :  { %v1350_v14 = vpop.f32.mrb[18].mxu1 }
 0x8da   :  { %v1399_v15 = vsub.f32 %v1350_v14, %v1968_v17  ;;  %v1722_v16 = vpop.f32.mrb[19].mxu1 }
 0x8dc   :  { %1410 = vst.msk [vmem:[%s2260_s9 + $0x20] sm:$0xff] %vm203_vm3, %v1399_v15 }
 0x8dd   :  { %v1355_v19 = vpop.f32.mrb[20].mxu1 }
 0x8de   :  { %v1839_v21 = vpop.eup %1838  ;;  %v1400_v23 = vsub.f32 %v1355_v19, %v1986_v20  ;;  %v1725_v26 = vpop.f32.mrb[21].mxu1 }
 0x8df   :  { %1143 = vst.msk [vmem:[#allocation3 + $0x48] sm:$0xff] %vm338_vm5, %v1839_v21  ;;  %1698 = vmatmul.mubr.msk.f32.vlgmr.msra.gmra.mrb[18].mxu0 %vm338_vm5, %v1839_v21 }
 0x8e0   :  { %1411 = vst.msk [vmem:[%s2260_s9 + $0x28] sm:$0xff] %vm203_vm3, %v1400_v23  ;;  %1809 = vmatpush3.bf16.msra.mxu0 %v1808_v60  ;;  %1708 = vmatprep.mubr.msk.f32.mxu0 %vm1843_vm4, %v1844_v25 }
 0x8e1   :  { %v1360_v17 = vpop.f32.mrb[22].mxu1  ;;  %1810 = vmatprep.subr.bf16.mxu0 %v1842_v12  ;;  %v1392_v12 = vld [vmem:[%s2254_s1 + $0x40] sm:$0xff] }
 0x8e2   :  { %v1401_v27 = vsub.f32 %v1360_v17, %v1995_v22  ;;  %v1728_v20 = vpop.f32.mrb[23].mxu1 }
 0x8e4   :  { %1412 = vst.msk [vmem:[%s2260_s9 + $0x30] sm:$0xff] %vm203_vm3, %v1401_v27  ;;  %1812 = vmatpush3.bf16.msra.mxu0 %v1811_v63 }
 0x8e5   :  { %v1365_v28 = vpop.f32.mrb[24].mxu1 }
 0x8e6   :  { %v1402_v30 = vsub.f32 %v1365_v28, %v2010_v24  ;;  %v1731_v31 = vpop.f32.mrb[25].mxu1  ;;  %v1229_v35 = vld [vmem:[#allocation3 + $0x48] sm:$0xff] }
 0x8e7   :  { %1709 = vmatmul.mubr.msk.f32.vlgmr.msra.gmra.mrb[20].mxu0 %vm338_vm5, %v1220_v34  ;;  %1736 = vmatmul.mubr.msk.f32.gmra.mrb[28].mxu1 %vm338_vm5, %v1229_v35 }
 0x8e8   :  { %1413 = vst.msk [vmem:[%s2260_s9 + $0x38] sm:$0xff] %vm203_vm3, %v1402_v30  ;;  %1711 = vmatprep.mubr.msk.f32.mxu0 %vm1843_vm4, %v1844_v25  ;;  %1738 = vmatprep.mubr.msk.f32.mxu1 %vm1843_vm4, %v1844_v25 }
 0x8e9   :  { %v1370_v22 = vpop.f32.mrb[26].mxu1 }
 0x8ea   :  { %v1403_v24 = vsub.f32 %v1370_v22, %v1392_v12  ;;  %v1734_v36 = vpop.f32.mrb[27].mxu1 }
 0x8eb   :  { %1712 = vmatmul.mubr.msk.f32.gmra.mrb[22].mxu0 %vm338_vm5, %v1221_v37 }
 0x8ec   :  { %1414 = vst.msk [vmem:[%s2260_s9 + $0x40] sm:$0xff] %vm203_vm3, %v1403_v24  ;;  %1714 = vmatprep.mubr.msk.f32.mxu0 %vm1843_vm4, %v1844_v25 }
 0x8ef   :  { %1715 = vmatmul.mubr.msk.f32.gmra.mrb[24].mxu0 %vm338_vm5, %v1222_v38 }
 0x8f0   :  { %1717 = vmatprep.mubr.msk.f32.mxu0 %vm1843_vm4, %v1844_v25 }
 0x8f3   :  { %1718 = vmatmul.mubr.msk.f32.gmra.mrb[26].mxu0 %vm338_vm5, %v1223_v39 }
 0x9b2   :  { %v1213_v40 = vpop.f32.mrb[18].mxu0 }
 0x9b3   :  { %v1214_v41 = vadd.f32 %v2052_v33, %v1213_v40  ;;  %v1699_v42 = vpop.f32.mrb[19].mxu0 }
 0x9b5   :  { %1840 = vtanh.f32 %v1214_v41 }
 0x9ba   :  { %v1330_v44 = vpop.f32.mrb[20].mxu0  ;;  %v1375_v45 = vpop.f32.mrb[28].mxu1 }
 0x9bb   :  { %v1395_v46 = vsub.f32 %v1330_v44, %v1909_v3  ;;  %v1710_v47 = vpop.f32.mrb[21].mxu0  ;;  %v1404_v48 = vsub.f32 %v1375_v45, %v1393_v43  ;;  %v1737_v49 = vpop.f32.mrb[29].mxu1 }
 0x9bd   :  { %1406 = vst.msk [vmem:[%s2260_s9] sm:$0xff] %vm203_vm3, %v1395_v46  ;;  %1415 = vst.msk [vmem:[%s2260_s9 + $0x48] sm:$0xff] %vm203_vm3, %v1404_v48 }
 0x9be   :  { %v1335_v25 = vpop.f32.mrb[22].mxu0 }
 0x9bf   :  { %v1841_v33 = vpop.eup %1840  ;;  %v1396_v50 = vsub.f32 %v1335_v25, %v1917_v5  ;;  %v1713_v51 = vpop.f32.mrb[23].mxu0 }
 0x9c0   :  { %1219 = vst.msk [vmem:[#allocation3 + $0x50] sm:$0xff] %vm338_vm5, %v1841_v33 }
 0x9c1   :  { %1407 = vst.msk [vmem:[%s2260_s9 + $0x8] sm:$0xff] %vm203_vm3, %v1396_v50 }
 0x9c2   :  { %v1340_v3 = vpop.f32.mrb[24].mxu0 }
 0x9c3   :  { %v1397_v29 = vsub.f32 %v1340_v3, %v1938_v10  ;;  %v1716_v32 = vpop.f32.mrb[25].mxu0  ;;  %v1394_v10 = vld [vmem:[%s2254_s1 + $0x50] sm:$0xff] }
 0x9c5   :  { %1408 = vst.msk [vmem:[%s2260_s9 + $0x10] sm:$0xff] %vm203_vm3, %v1397_v29 }
 0x9c6   :  { %v1345_v52 = vpop.f32.mrb[26].mxu0 }
 0x9c7   :  { %v1398_v5 = vsub.f32 %v1345_v52, %v1951_v13  ;;  %v1719_v53 = vpop.f32.mrb[27].mxu0  ;;  %v1230_v54 = vld [vmem:[#allocation3 + $0x50] sm:$0xff] }
 0x9c8   :  { %1739 = vmatmul.mubr.msk.f32.gmra.mrb[30].mxu1 %vm338_vm5, %v1230_v54 }
 0x9c9   :  { %1409 = vst.msk [vmem:[%s2260_s9 + $0x18] sm:$0xff] %vm203_vm3, %v1398_v5 }
 0xa9b   :  { %v1380_v55 = vpop.f32.mrb[30].mxu1 }
 0xa9c   :  { %v1405_v56 = vsub.f32 %v1380_v55, %v1394_v10  ;;  %v1740_v57 = vpop.f32.mrb[31].mxu1 }
 0xa9e   :  { %1416 = vst.msk [vmem:[%s2260_s9 + $0x50] sm:$0xff] %vm203_vm3, %v1405_v56 }

</bundles_post_ra>
